<compile_context>
chip_gen: v7x
topology: tpu7x:2x2x1
jax: 0.10.0
libtpu: 0.0.40
codegen_flags: <defaults>
</compile_context>

<pallas_src>
import functools

import jax
import jax.numpy as jnp
from jax.experimental import pallas as pl
from jax.experimental.pallas import tpu as pltpu


# ----------------------------------------------------------------------------
# Fused 'valid' conv kernel, CHW layout with flattened spatial on the lane axis.
# ----------------------------------------------------------------------------
def _make_fused_conv_kernel(KH, KW, Cin, W, WIDE, Cout):
    """Valid, stride-1 2-D conv for one batch element.

    Refs:
      x_ref : (1, Cin, H*W)          input image, spatial flattened on lanes
      w_ref : (KH, Cout, KW*Cin)     one (Cout, KW*Cin) matrix per filter ROW,
                                     column index = kw*Cin + ci
      b_ref : (Cout, 1)              bias
      o_ref : (1, Cout, WIDE)        "wide" output slab; lane q = ho*W + wo_raw
                                     (columns wo_raw >= Wo are wrap-around garbage
                                     and are cropped in the wrapper)

    For q = ho*W + wo (wo < Wo) and tap offset off = kh*W + kw:
        x_flat[ci, q + off] == x[ci, ho+kh, wo+kw]
    so, per filter row kh, stacking the KW shifted lane-slices along sublanes and
    multiplying by the (Cout, KW*Cin) row matrix accumulates exactly the
    cross-correlation PyTorch's Conv2d computes.  WIDE = (Ho-1)*W + Wo, which also
    guarantees off + WIDE <= H*W for every tap (no out-of-bounds reads).
    """

    def kernel(x_ref, w_ref, b_ref, o_ref):
        x = x_ref[0]                                             # (Cin, H*W)
        # Bias broadcast / accumulator init hoisted: once per grid step.
        acc = jnp.broadcast_to(b_ref[...], (Cout, WIDE)).astype(jnp.float32)
        for kh in range(KH):                                     # fully unrolled
            base = kh * W
            # Pack the KW shifted taps of this filter row: (KW*Cin, WIDE).
            slab = jnp.concatenate(
                [x[:, base + kw:base + kw + WIDE] for kw in range(KW)], axis=0)
            # One (Cout, KW*Cin) @ (KW*Cin, WIDE) MXU matmul per filter row.
            acc = acc + jnp.dot(w_ref[kh], slab,
                                preferred_element_type=jnp.float32)
        o_ref[0] = acc.astype(o_ref.dtype)

    return kernel


def conv2d_valid_fused(x_nchw, w_hwio, b):
    """x: (N, Cin, H, W) f32, w: (KH, KW, Cin, Cout) HWIO, b: (Cout,)
    -> (N, Cout, Ho, Wo) f32 ('valid' cross-correlation, stride 1)."""
    N, Cin, H, W = x_nchw.shape
    KH, KW, _, Cout = w_hwio.shape
    Ho, Wo = H - KH + 1, W - KW + 1
    WIDE = (Ho - 1) * W + Wo                     # == H*W - (KH-1)*W - (KW-1)

    x_flat = x_nchw.reshape(N, Cin, H * W)       # metadata-only reshape
    # One ready-to-use (Cout, KW*Cin) LHS per filter row; column = kw*Cin + ci.
    w_rows = jnp.transpose(w_hwio, (0, 3, 1, 2)).reshape(KH, Cout, KW * Cin)

    kernel = _make_fused_conv_kernel(KH, KW, Cin, W, WIDE, Cout)
    out_wide = pl.pallas_call(
        kernel,
        out_shape=jax.ShapeDtypeStruct((N, Cout, WIDE), jnp.float32),
        grid=(N,),
        in_specs=[
            pl.BlockSpec((1, Cin, H * W), lambda n: (n, 0, 0)),
            pl.BlockSpec((KH, Cout, KW * Cin), lambda n: (0, 0, 0)),
            pl.BlockSpec((Cout, 1), lambda n: (0, 0)),
        ],
        out_specs=pl.BlockSpec((1, Cout, WIDE), lambda n: (n, 0, 0)),
        compiler_params=pltpu.CompilerParams(
            dimension_semantics=("parallel",)),   # v7x: one batch element per TC
    )(x_flat, w_rows, b.reshape(Cout, 1))

    # Un-flatten the slab: rows are W wide; pad the missing tail of the last row,
    # reshape, then crop the wrap-around columns (wo >= Wo). Cheap XLA plumbing.
    out = jnp.pad(out_wide, ((0, 0), (0, 0), (0, Ho * W - WIDE)))
    return out.reshape(N, Cout, Ho, W)[:, :, :, :Wo]


# ----------------------------------------------------------------------------
# Trace-time algebraic fold of the three linear convs into one 5x5 conv.
# ----------------------------------------------------------------------------
def fold_conv_params(params):
    """Compose conv1x1 -> conv3x3 -> conv3x3 (all cross-correlation, HWIO) into a
    single effective (5,5,Cin,Cout) filter + bias. Exact linear composition
    (there are no nonlinearities between the layers)."""
    w0, b0 = params["w0"], params["b0"]          # (1,1,C,C),   (C,)
    w1, b1 = params["w1"], params["b1"]          # (3,3,C,h1),  (h1,)
    w2, b2 = params["w2"], params["b2"]          # (3,3,h1,h2), (h2,)

    # Fold the 1x1 into the first 3x3.
    w01 = jnp.einsum("im,abmh->abih", w0[0, 0], w1)           # (3,3,C,h1)
    b01 = b1 + jnp.einsum("m,abmh->h", b0, w1)                # (h1,)

    # Compose the two 3x3 cross-correlations into a 5x5 one:
    #   C[a+c, b+d] += w01[a,b] @ w2[c,d]   (contracted over the hidden channel)
    KA = w01.shape[0]
    KB = w2.shape[0]
    Cin, Cout = w01.shape[2], w2.shape[3]
    w_eff = jnp.zeros((KA + KB - 1, KA + KB - 1, Cin, Cout), jnp.float32)
    for a in range(KA):
        for bb in range(KA):
            w_eff = w_eff.at[a:a + KB, bb:bb + KB].add(
                jnp.einsum("ih,cdho->cdio", w01[a, bb], w2))
    b_eff = b2 + jnp.einsum("h,cdho->o", b01, w2)             # (h2,)
    return w_eff, b_eff


# ----------------------------------------------------------------------------
# Module wrapper (matches CNNEncoder.forward semantics).
# ----------------------------------------------------------------------------
def init_params(key, num_nodes, hidden1=12, hidden2=8):
    """Deterministic synthetic parameters; weights stored HWIO."""
    ks = jax.random.split(key, 6)
    scale = 0.1
    return {
        "w0": scale * jax.random.normal(ks[0], (1, 1, num_nodes, num_nodes), jnp.float32),
        "b0": scale * jax.random.normal(ks[1], (num_nodes,), jnp.float32),
        "w1": scale * jax.random.normal(ks[2], (3, 3, num_nodes, hidden1), jnp.float32),
        "b1": scale * jax.random.normal(ks[3], (hidden1,), jnp.float32),
        "w2": scale * jax.random.normal(ks[4], (3, 3, hidden1, hidden2), jnp.float32),
        "b2": scale * jax.random.normal(ks[5], (hidden2,), jnp.float32),
    }


@functools.partial(jax.jit, static_argnames=())
def cnn_encoder_forward(params, X_nchw, nodes=None):
    """Mirrors CNNEncoder.forward(X, nodes). `nodes` is unused in the reference."""
    del nodes
    # Tiny weight-space einsums (XLA folds/fuses these; the heavy path is the
    # single Pallas conv kernel below).
    w_eff, b_eff = fold_conv_params(params)
    return conv2d_valid_fused(X_nchw, w_eff, b_eff)          # (N, hidden2, Ho, Wo)


def _xla_reference(params, X_nchw):
    """Pure-XLA reference: the original three separate convs."""
    x = jnp.transpose(X_nchw, (0, 2, 3, 1))
    for wk, bk in (("w0", "b0"), ("w1", "b1"), ("w2", "b2")):
        x = jax.lax.conv_general_dilated(
            x, params[wk], window_strides=(1, 1), padding="VALID",
            dimension_numbers=("NHWC", "HWIO", "NHWC"),
        ) + params[bk]
    return jnp.transpose(x, (0, 3, 1, 2))


if __name__ == "__main__":
    # Small shapes consistent with the module: batch=2, num_nodes=4, bbx_size=16.
    batch, num_nodes, bbx_size = 2, 4, 16
    latent_dims = 32  # unused by forward, kept for signature parity

    key = jax.random.PRNGKey(0)
    kx, kp = jax.random.split(key)
    X = jax.random.normal(kx, (batch, num_nodes, bbx_size, bbx_size), jnp.float32)
    nodes = jnp.arange(num_nodes)  # unused by forward, matches PyTorch signature

    params = init_params(kp, num_nodes)

    out = cnn_encoder_forward(params, X, nodes)
    out = jax.block_until_ready(out)

    # Expected output shape: (batch, hidden2=8, bbx_size-4, bbx_size-4)
    assert out.shape == (batch, 8, bbx_size - 4, bbx_size - 4), out.shape

    ref = _xla_reference(params, X)
    err = float(jnp.max(jnp.abs(out - ref)))
    assert jnp.allclose(out, ref, atol=1e-4, rtol=1e-4), err

    print("KERNEL_OK")
</pallas_src>

<mosaic_0001>
module attributes {stable_mosaic.version = 11 : i64} {
  func.func @kernel(%arg0: i32, %arg1: memref<1x4x256xf32, #tpu.memory_space<vmem>>, %arg2: memref<5x8x20xf32, #tpu.memory_space<vmem>>, %arg3: memref<8x1xf32, #tpu.memory_space<vmem>>, %arg4: memref<1x8x188xf32, #tpu.memory_space<vmem>>) attributes {dimension_semantics = [#tpu.dimension_semantics<parallel>], iteration_bounds = array<i64: 2>, scalar_prefetch = 0 : i64, scratch_operands = 0 : i64, tpu.core_type = #tpu.core_type<tc>, window_params = [{transform_indices = @transform_0, window_bounds = array<i64: 1, 4, 256>}, {pipeline_mode = #tpu.pipeline_mode<synchronous>, transform_indices = @transform_1, window_bounds = array<i64: 5, 8, 20>}, {pipeline_mode = #tpu.pipeline_mode<synchronous>, transform_indices = @transform_2, window_bounds = array<i64: 8, 1>}, {transform_indices = @transform_3, window_bounds = array<i64: 1, 8, 188>}]} {
    %c0 = arith.constant 0 : index
    %c0_0 = arith.constant 0 : index
    %c0_1 = arith.constant 0 : index
    %0 = vector.load %arg1[%c0, %c0_0, %c0_1] : memref<1x4x256xf32, #tpu.memory_space<vmem>>, vector<1x4x256xf32>
    %1 = vector.shape_cast %0 : vector<1x4x256xf32> to vector<4x256xf32>
    %c0_2 = arith.constant 0 : index
    %c0_3 = arith.constant 0 : index
    %2 = vector.load %arg3[%c0_2, %c0_3] : memref<8x1xf32, #tpu.memory_space<vmem>>, vector<8x1xf32>
    %3 = vector.shape_cast %2 : vector<8x1xf32> to vector<8x1xf32>
    %4 = vector.broadcast %3 : vector<8x1xf32> to vector<8x188xf32>
    %5 = vector.extract_strided_slice %1 {offsets = [0, 0], sizes = [4, 188], strides = [1, 1]} : vector<4x256xf32> to vector<4x188xf32>
    %6 = vector.extract_strided_slice %1 {offsets = [0, 1], sizes = [4, 188], strides = [1, 1]} : vector<4x256xf32> to vector<4x188xf32>
    %7 = vector.extract_strided_slice %1 {offsets = [0, 2], sizes = [4, 188], strides = [1, 1]} : vector<4x256xf32> to vector<4x188xf32>
    %8 = vector.extract_strided_slice %1 {offsets = [0, 3], sizes = [4, 188], strides = [1, 1]} : vector<4x256xf32> to vector<4x188xf32>
    %9 = vector.extract_strided_slice %1 {offsets = [0, 4], sizes = [4, 188], strides = [1, 1]} : vector<4x256xf32> to vector<4x188xf32>
    %10 = tpu.concatenate %5, %6, %7, %8, %9 in 0 : vector<4x188xf32>, vector<4x188xf32>, vector<4x188xf32>, vector<4x188xf32>, vector<4x188xf32> -> vector<20x188xf32>
    %c0_4 = arith.constant 0 : index
    %c0_5 = arith.constant 0 : index
    %c0_6 = arith.constant 0 : index
    %11 = vector.load %arg2[%c0_4, %c0_5, %c0_6] : memref<5x8x20xf32, #tpu.memory_space<vmem>>, vector<1x8x20xf32>
    %12 = vector.shape_cast %11 : vector<1x8x20xf32> to vector<8x20xf32>
    %cst = arith.constant dense<0.000000e+00> : vector<8x188xf32>
    %13 = tpu.matmul %12, %10, %cst {dimension_numbers = #tpu.dot_dimension_numbers<[1], [0], [0], [1], [0, 0, 1, 1], [], []>} : vector<8x20xf32>, vector<20x188xf32>, vector<8x188xf32> -> vector<8x188xf32>
    %14 = arith.addf %4, %13 : vector<8x188xf32>
    %15 = vector.extract_strided_slice %1 {offsets = [0, 16], sizes = [4, 188], strides = [1, 1]} : vector<4x256xf32> to vector<4x188xf32>
    %16 = vector.extract_strided_slice %1 {offsets = [0, 17], sizes = [4, 188], strides = [1, 1]} : vector<4x256xf32> to vector<4x188xf32>
    %17 = vector.extract_strided_slice %1 {offsets = [0, 18], sizes = [4, 188], strides = [1, 1]} : vector<4x256xf32> to vector<4x188xf32>
    %18 = vector.extract_strided_slice %1 {offsets = [0, 19], sizes = [4, 188], strides = [1, 1]} : vector<4x256xf32> to vector<4x188xf32>
    %19 = vector.extract_strided_slice %1 {offsets = [0, 20], sizes = [4, 188], strides = [1, 1]} : vector<4x256xf32> to vector<4x188xf32>
    %20 = tpu.concatenate %15, %16, %17, %18, %19 in 0 : vector<4x188xf32>, vector<4x188xf32>, vector<4x188xf32>, vector<4x188xf32>, vector<4x188xf32> -> vector<20x188xf32>
    %c1 = arith.constant 1 : index
    %c0_7 = arith.constant 0 : index
    %c0_8 = arith.constant 0 : index
    %21 = vector.load %arg2[%c1, %c0_7, %c0_8] : memref<5x8x20xf32, #tpu.memory_space<vmem>>, vector<1x8x20xf32>
    %22 = vector.shape_cast %21 : vector<1x8x20xf32> to vector<8x20xf32>
    %cst_9 = arith.constant dense<0.000000e+00> : vector<8x188xf32>
    %23 = tpu.matmul %22, %20, %cst_9 {dimension_numbers = #tpu.dot_dimension_numbers<[1], [0], [0], [1], [0, 0, 1, 1], [], []>} : vector<8x20xf32>, vector<20x188xf32>, vector<8x188xf32> -> vector<8x188xf32>
    %24 = arith.addf %14, %23 : vector<8x188xf32>
    %25 = vector.extract_strided_slice %1 {offsets = [0, 32], sizes = [4, 188], strides = [1, 1]} : vector<4x256xf32> to vector<4x188xf32>
    %26 = vector.extract_strided_slice %1 {offsets = [0, 33], sizes = [4, 188], strides = [1, 1]} : vector<4x256xf32> to vector<4x188xf32>
    %27 = vector.extract_strided_slice %1 {offsets = [0, 34], sizes = [4, 188], strides = [1, 1]} : vector<4x256xf32> to vector<4x188xf32>
    %28 = vector.extract_strided_slice %1 {offsets = [0, 35], sizes = [4, 188], strides = [1, 1]} : vector<4x256xf32> to vector<4x188xf32>
    %29 = vector.extract_strided_slice %1 {offsets = [0, 36], sizes = [4, 188], strides = [1, 1]} : vector<4x256xf32> to vector<4x188xf32>
    %30 = tpu.concatenate %25, %26, %27, %28, %29 in 0 : vector<4x188xf32>, vector<4x188xf32>, vector<4x188xf32>, vector<4x188xf32>, vector<4x188xf32> -> vector<20x188xf32>
    %c2 = arith.constant 2 : index
    %c0_10 = arith.constant 0 : index
    %c0_11 = arith.constant 0 : index
    %31 = vector.load %arg2[%c2, %c0_10, %c0_11] : memref<5x8x20xf32, #tpu.memory_space<vmem>>, vector<1x8x20xf32>
    %32 = vector.shape_cast %31 : vector<1x8x20xf32> to vector<8x20xf32>
    %cst_12 = arith.constant dense<0.000000e+00> : vector<8x188xf32>
    %33 = tpu.matmul %32, %30, %cst_12 {dimension_numbers = #tpu.dot_dimension_numbers<[1], [0], [0], [1], [0, 0, 1, 1], [], []>} : vector<8x20xf32>, vector<20x188xf32>, vector<8x188xf32> -> vector<8x188xf32>
    %34 = arith.addf %24, %33 : vector<8x188xf32>
    %35 = vector.extract_strided_slice %1 {offsets = [0, 48], sizes = [4, 188], strides = [1, 1]} : vector<4x256xf32> to vector<4x188xf32>
    %36 = vector.extract_strided_slice %1 {offsets = [0, 49], sizes = [4, 188], strides = [1, 1]} : vector<4x256xf32> to vector<4x188xf32>
    %37 = vector.extract_strided_slice %1 {offsets = [0, 50], sizes = [4, 188], strides = [1, 1]} : vector<4x256xf32> to vector<4x188xf32>
    %38 = vector.extract_strided_slice %1 {offsets = [0, 51], sizes = [4, 188], strides = [1, 1]} : vector<4x256xf32> to vector<4x188xf32>
    %39 = vector.extract_strided_slice %1 {offsets = [0, 52], sizes = [4, 188], strides = [1, 1]} : vector<4x256xf32> to vector<4x188xf32>
    %40 = tpu.concatenate %35, %36, %37, %38, %39 in 0 : vector<4x188xf32>, vector<4x188xf32>, vector<4x188xf32>, vector<4x188xf32>, vector<4x188xf32> -> vector<20x188xf32>
    %c3 = arith.constant 3 : index
    %c0_13 = arith.constant 0 : index
    %c0_14 = arith.constant 0 : index
    %41 = vector.load %arg2[%c3, %c0_13, %c0_14] : memref<5x8x20xf32, #tpu.memory_space<vmem>>, vector<1x8x20xf32>
    %42 = vector.shape_cast %41 : vector<1x8x20xf32> to vector<8x20xf32>
    %cst_15 = arith.constant dense<0.000000e+00> : vector<8x188xf32>
    %43 = tpu.matmul %42, %40, %cst_15 {dimension_numbers = #tpu.dot_dimension_numbers<[1], [0], [0], [1], [0, 0, 1, 1], [], []>} : vector<8x20xf32>, vector<20x188xf32>, vector<8x188xf32> -> vector<8x188xf32>
    %44 = arith.addf %34, %43 : vector<8x188xf32>
    %45 = vector.extract_strided_slice %1 {offsets = [0, 64], sizes = [4, 188], strides = [1, 1]} : vector<4x256xf32> to vector<4x188xf32>
    %46 = vector.extract_strided_slice %1 {offsets = [0, 65], sizes = [4, 188], strides = [1, 1]} : vector<4x256xf32> to vector<4x188xf32>
    %47 = vector.extract_strided_slice %1 {offsets = [0, 66], sizes = [4, 188], strides = [1, 1]} : vector<4x256xf32> to vector<4x188xf32>
    %48 = vector.extract_strided_slice %1 {offsets = [0, 67], sizes = [4, 188], strides = [1, 1]} : vector<4x256xf32> to vector<4x188xf32>
    %49 = vector.extract_strided_slice %1 {offsets = [0, 68], sizes = [4, 188], strides = [1, 1]} : vector<4x256xf32> to vector<4x188xf32>
    %50 = tpu.concatenate %45, %46, %47, %48, %49 in 0 : vector<4x188xf32>, vector<4x188xf32>, vector<4x188xf32>, vector<4x188xf32>, vector<4x188xf32> -> vector<20x188xf32>
    %c4 = arith.constant 4 : index
    %c0_16 = arith.constant 0 : index
    %c0_17 = arith.constant 0 : index
    %51 = vector.load %arg2[%c4, %c0_16, %c0_17] : memref<5x8x20xf32, #tpu.memory_space<vmem>>, vector<1x8x20xf32>
    %52 = vector.shape_cast %51 : vector<1x8x20xf32> to vector<8x20xf32>
    %cst_18 = arith.constant dense<0.000000e+00> : vector<8x188xf32>
    %53 = tpu.matmul %52, %50, %cst_18 {dimension_numbers = #tpu.dot_dimension_numbers<[1], [0], [0], [1], [0, 0, 1, 1], [], []>} : vector<8x20xf32>, vector<20x188xf32>, vector<8x188xf32> -> vector<8x188xf32>
    %54 = arith.addf %44, %53 : vector<8x188xf32>
    %c0_19 = arith.constant 0 : index
    %c0_20 = arith.constant 0 : index
    %c0_21 = arith.constant 0 : index
    %55 = vector.load %arg4[%c0_19, %c0_20, %c0_21] : memref<1x8x188xf32, #tpu.memory_space<vmem>>, vector<1x8x188xf32>
    %56 = vector.shape_cast %55 : vector<1x8x188xf32> to vector<8x188xf32>
    %57 = vector.shape_cast %54 : vector<8x188xf32> to vector<1x8x188xf32>
    tpu.vector_store %arg4[%c0_19, %c0_20, %c0_21], %57 {strides = array<i32>} : memref<1x8x188xf32, #tpu.memory_space<vmem>>, vector<1x8x188xf32>,
    return
  }
  func.func @transform_0(%arg0: i32) -> (i32, i32, i32) {
    %c0_i32 = arith.constant 0 : i32
    %c0_i32_0 = arith.constant 0 : i32
    %c0_i32_1 = arith.constant 0 : i32
    return %arg0, %c0_i32, %c0_i32_0 : i32, i32, i32
  }
  func.func @transform_1(%arg0: i32) -> (i32, i32, i32) {
    %c0_i32 = arith.constant 0 : i32
    %c0_i32_0 = arith.constant 0 : i32
    %c0_i32_1 = arith.constant 0 : i32
    %c0_i32_2 = arith.constant 0 : i32
    return %c0_i32, %c0_i32_0, %c0_i32_1 : i32, i32, i32
  }
  func.func @transform_2(%arg0: i32) -> (i32, i32) {
    %c0_i32 = arith.constant 0 : i32
    %c0_i32_0 = arith.constant 0 : i32
    %c0_i32_1 = arith.constant 0 : i32
    return %c0_i32, %c0_i32_0 : i32, i32
  }
  func.func @transform_3(%arg0: i32) -> (i32, i32, i32) {
    %c0_i32 = arith.constant 0 : i32
    %c0_i32_0 = arith.constant 0 : i32
    %c0_i32_1 = arith.constant 0 : i32
    return %arg0, %c0_i32, %c0_i32_0 : i32, i32, i32
  }
}

</mosaic_0001>

<bundles_post_ra>
// kernel: cnn_encoder_forward.1
= control target key start
LH: loop header
LB: loop body
LE: loop exit
PB: predicated region body
PF: predicated region fallthrough
CT: control target
= control target key end

     0   :  { %s946_s12 = smov 0   ;;  %s1021_s0 = inlined_call_operand.vmem [shape: f32[2,4,256], index: 0, kind: input, shape index: {}]   ;;  %s1022_s1 = inlined_call_operand.vmem [shape: f32[5,8,20], index: 1, kind: input, shape index: {}]   ;;  %s1023_s2 = inlined_call_operand.vmem [shape: f32[8,1], index: 2, kind: input, shape index: {}]   ;;  %s1024_s3 = inlined_call_operand.vmem [shape: f32[2,8,188], index: 3, kind: output, shape index: {}]  }
   0x1 LB: > { %s769_s13 = sadd.s32 4294967295, %s914_s12   ;;  %p773_p0 = scmp.ge.s32.totalorder %s914_s12, 1  ;;  %s914_s12 = sphi %s946_s12, %s13_s12  }
   0x2   : > { %p137_p1 = scmp.lt.s32.totalorder %s914_s12, 3 }
   0x4   : > { %p138_p2 = pnand %p773_p0, %p137_p1 }
   0x5   : > { %p161_p3 = scmp.lt.s32.totalorder (!%p138_p2), %s769_s13, 1  ;;  %s916_s18 = smov (!%p138_p2), 127   ;;  %vm186_vm0 = vcmask (!%p138_p2), 1039360   ;;  %vm202_vm1 = vcmask (!%p138_p2), 1022976   ;;  %vm194_vm2 = vcmask (!%p138_p2), 1031168   ;;  %vm212_vm3 = vcmask (!%p138_p2), 1043456  }
   0x6   : > { %141 = sbr.rel (%p138_p2) target bundleno = 506 (0x1fa), region = 32  ;;  %s917_s19 = smov (!%p138_p2), 125   ;;  %vm210_vm4 = vcmask (!%p138_p2), 1014784   ;;  %v921_v27 = vmov (!%p138_p2), 0.0   ;;  %vm218_vm5 = vcmask (!%p138_p2), 162816   ;;  %v217_v29 = vld [vmem:[%s1022_s1] sm:$0xff] (!%p138_p2) }
   0x7   : > { %s918_s20 = smov (!%p138_p2), 126   ;;  %s919_s21 = smov (!%p138_p2), 124   ;;  %498 = vmatprep.mubr.f32.mxu0 (!%p138_p2), %v921_v27  ;;  %290 = vmatprep.mubr.f32.mxu1 (!%p138_p2), %v921_v27  ;;  %v924_v30 = vmov (!%p138_p2), 0   ;;  %v172_v31 = vld [vmem:[%s1023_s2] sm:$0xff] (!%p138_p2)  ;;  %vm419_vm6 = vcmask (!%p138_p2), 785408   ;;  %v785_v50 = vld [vmem:[%s1022_s1 + $0x10] sm:$0xff] (!%p138_p2) }
   0x8   : > { %s920_s22 = smov (!%p138_p2), 96   ;;  %s922_s25 = smov (!%p138_p2), 80   ;;  %904 = vset.pattern.permute.xlu1 (!%p138_p2), %v924_v30  ;;  %905 = vset.pattern.permute.xlu0 (!%p138_p2), %v924_v30  ;;  %vm521_vm7 = vcmask (!%p138_p2), 654336   ;;  %vm317_vm8 = vcmask (!%p138_p2), 916480   ;;  %vm623_vm9 = vcmask (!%p138_p2), 523264   ;;  %vm712_vm10 = vcmask (!%p138_p2), 490496  }
   0x9   : > { %s923_s26 = smov (!%p138_p2), 112   ;;  %s925_s27 = smov (!%p138_p2), 64  }
   0xd   : > { %s1026_s13 = smov (!%p161_p3, %s769_s13), 1 }
   0xe   : > { %s799_s14 = sshll.u32 %s1026_s13, 3  ;;  %s800_s11 = sshll.u32 %s1026_s13, 4 }
   0xf   : > { %s165_s17 = scalar_lea.vmem %s1021_s0, %s799_s14  ;;  %s170_s16 = scalar_lea.vmem %s1024_s3, %s800_s11 }
  0x10   : > { %v171_v0 = vld [vmem:[%s165_s17] sm:$0xff] }
  0x11   : > { %v181_v1 = vcombine.low %v171_v0, %v171_v0  ;;  %v179_v2 = vcombine.high %v171_v0, %v171_v0 }
  0x13   : > { %v849_v3 = vpack.i.bf16 %v171_v0, %v181_v1  ;;  %v854_v4 = vpack.i.bf16 %v179_v2, %v171_v0 }
  0x15   : > { %850 = vrot.lane.b32.xlu0 %v849_v3, %s916_s18  ;;  %860 = vrot.lane.b32.xlu1 %v849_v3, %s917_s19 }
  0x19   : > { %855 = vrot.lane.b32.xlu0 %v854_v4, %s918_s20  ;;  %206 = vrot.lane.b32.xlu1 %v171_v0, %s919_s21 }
  0x1d   : > { %208 = vrot.lane.b32.xlu0 %v179_v2, %s919_s21 }
  0x87   : > { %v851_v5 = vpop.permute.xlu0 %850  ;;  %v861_v6 = vpop.permute.xlu1 %860 }
  0x88   : > { %v853_v7 = vunpack.i.h.bf16 %v851_v5  ;;  %v852_v8 = vunpack.i.l.bf16 %v851_v5  ;;  %v863_v9 = vunpack.i.h.bf16 %v861_v6  ;;  %v862_v10 = vunpack.i.l.bf16 %v861_v6 }
  0x8a   : > { %v187_v12 = vsel %vm186_vm0, %v852_v8, %v853_v7  ;;  %v203_v13 = vsel %vm202_vm1, %v862_v10, %v863_v9  ;;  %v214_v18 = vsel %vm212_vm3, %v179_v2, %v853_v7  ;;  %v789_v8 = vld [vmem:[%s1022_s1 + $0x18] sm:$0xff] }
  0x8b   : > { %v856_v11 = vpop.permute.xlu0 %855  ;;  %v207_v16 = vpop.permute.xlu1 %206  ;;  %v213_v22 = vsel %vm212_vm3, %v171_v0, %v187_v12 }
  0x8c   : > { %v858_v14 = vunpack.i.h.bf16 %v856_v11  ;;  %v857_v15 = vunpack.i.l.bf16 %v856_v11  ;;  %v864_v28 = vpack.i.bf16 %v214_v18, %v213_v22 }
  0x8e   : > { %v195_v17 = vsel %vm194_vm2, %v857_v15, %v858_v14  ;;  %v216_v19 = vsel %vm212_vm3, %v858_v14, %v863_v9 }
  0x8f   : > { %v209_v20 = vpop.permute.xlu0 %208  ;;  %v801_v21 = vpack.c.bf16 %v216_v19, %v214_v18  ;;  %v215_v23 = vsel %vm212_vm3, %v195_v17, %v203_v13  ;;  %v781_v18 = vld [vmem:[%s1022_s1 + $0x8] sm:$0xff] }
  0x90   : > { %417 = vrot.lane.b32.xlu0 %v209_v20, %s920_s22  ;;  %v211_v24 = vsel %vm210_vm4, %v207_v16, %v209_v20  ;;  %v803_v25 = vpack.c.bf16 %v215_v23, %v213_v22  ;;  %v869_v26 = vpack.i.bf16 %v216_v19, %v215_v23  ;;  %v793_v22 = vld [vmem:[%s1022_s1 + $0x20] sm:$0xff] }
  0x91   : > { %415 = vrot.lane.b32.xlu1 %v211_v24, %s920_s22  ;;  %802 = vmatprep.subr.bf16.mxu1 %v801_v21 }
  0x92   : > { %804 = vmatpush1.bf16.msra.mxu1 %v803_v25 }
  0x93   : > { %778 = vmatprep.subr.msk.mxu1 %vm212_vm3, %v209_v20 }
  0x94   : > { %870 = vrot.lane.b32.xlu0 %v869_v26, %s920_s22 }
  0x95   : > { %865 = vrot.lane.b32.xlu1 %v864_v28, %s920_s22 }
  0x96   : > { %779 = vmatpush1.msk.msra.mxu1 %vm212_vm3, %v211_v24 }
  0x97   : > { %780 = vmatmul.mubr.msk.f32.vlgmr.msra.gmra.mrb[0].mxu1 %vm218_vm5, %v217_v29 }
  0x98   : > { %519 = vrot.lane.b32.xlu0 %v209_v20, %s922_s25  ;;  %396 = vmatprep.mubr.f32.mxu1 %v921_v27 }
  0x99   : > { %517 = vrot.lane.b32.xlu1 %v211_v24, %s922_s25 }
  0x9c   : > { %880 = vrot.lane.b32.xlu0 %v869_v26, %s922_s25 }
  0x9d   : > { %875 = vrot.lane.b32.xlu1 %v864_v28, %s922_s25 }
  0xa0   : > { %890 = vrot.lane.b32.xlu0 %v869_v26, %s923_s26 }
  0xa1   : > { %885 = vrot.lane.b32.xlu1 %v864_v28, %s923_s26 }
  0xa4   : > { %900 = vrot.lane.b32.xlu0 %v869_v26, %s925_s27 }
  0xa5   : > { %895 = vrot.lane.b32.xlu1 %v864_v28, %s925_s27 }
  0xa8   : > { %315 = vrot.lane.b32.xlu0 %v209_v20, %s923_s26 }
  0xa9   : > { %313 = vrot.lane.b32.xlu1 %v211_v24, %s923_s26 }
  0xac   : > { %621 = vrot.lane.b32.xlu0 %v209_v20, %s925_s27 }
  0xad   : > { %619 = vrot.lane.b32.xlu1 %v211_v24, %s925_s27 }
  0xb1   : > { %175 = vperm.xlu1 %904, %v172_v31  }
 0x102   : > { %v418_v32 = vpop.permute.xlu0 %417 }
 0x103   : > { %v416_v33 = vpop.permute.xlu1 %415 }
 0x104   : > { %v422_v51 = vsel %vm419_vm6, %v416_v33, %v418_v32 }
 0x106   : > { %v871_v34 = vpop.permute.xlu0 %870 }
 0x107   : > { %v873_v35 = vunpack.i.h.bf16 %v871_v34  ;;  %v872_v36 = vunpack.i.l.bf16 %v871_v34  ;;  %v866_v37 = vpop.permute.xlu1 %865 }
 0x108   : > { %v868_v38 = vunpack.i.h.bf16 %v866_v37  ;;  %v867_v39 = vunpack.i.l.bf16 %v866_v37 }
 0x109   : > { %v421_v40 = vsel %vm419_vm6, %v872_v36, %v873_v35 }
 0x10a   : > { %v520_v41 = vpop.permute.xlu0 %519  ;;  %v809_v42 = vpack.c.bf16 %v873_v35, %v868_v38  ;;  %v420_v43 = vsel %vm419_vm6, %v867_v39, %v868_v38 }
 0x10b   : > { %v518_v44 = vpop.permute.xlu1 %517  ;;  %v811_v45 = vpack.c.bf16 %v421_v40, %v420_v43 }
 0x10c   : > { %810 = vmatprep.subr.bf16.mxu0 %v809_v42  ;;  %v524_v9 = vsel %vm521_vm7, %v518_v44, %v520_v41 }
 0x10d   : > { %812 = vmatpush1.bf16.msra.mxu0 %v811_v45 }
 0x10e   : > { %v881_v46 = vpop.permute.xlu0 %880  ;;  %786 = vmatprep.subr.msk.mxu0 %vm212_vm3, %v418_v32 }
 0x10f   : > { %v883_v47 = vunpack.i.h.bf16 %v881_v46  ;;  %v882_v48 = vunpack.i.l.bf16 %v881_v46  ;;  %v876_v49 = vpop.permute.xlu1 %875 }
 0x110   : > { %v878_v52 = vunpack.i.h.bf16 %v876_v49  ;;  %v877_v53 = vunpack.i.l.bf16 %v876_v49 }
 0x111   : > { %v523_v54 = vsel %vm521_vm7, %v882_v48, %v883_v47  ;;  %787 = vmatpush1.msk.msra.mxu0 %vm212_vm3, %v422_v51 }
 0x112   : > { %v813_v55 = vpack.c.bf16 %v883_v47, %v878_v52  ;;  %v522_v56 = vsel %vm521_vm7, %v877_v53, %v878_v52  ;;  %v891_v57 = vpop.permute.xlu0 %890  ;;  %788 = vmatmul.mubr.msk.f32.vlgmr.msra.gmra.mrb[0].mxu0 %vm218_vm5, %v785_v50 }
 0x113   : > { %v815_v58 = vpack.c.bf16 %v523_v54, %v522_v56  ;;  %v893_v59 = vunpack.i.h.bf16 %v891_v57  ;;  %v892_v60 = vunpack.i.l.bf16 %v891_v57  ;;  %v886_v61 = vpop.permute.xlu1 %885  ;;  %600 = vmatprep.mubr.f32.mxu0 %v921_v27 }
 0x114   : > { %v888_v62 = vunpack.i.h.bf16 %v886_v61  ;;  %v887_v63 = vunpack.i.l.bf16 %v886_v61  ;;  %814 = vmatprep.subr.bf16.mxu0 %v813_v55 }
 0x115   : > { %v319_v0 = vsel %vm317_vm8, %v892_v60, %v893_v59  ;;  %816 = vmatpush1.bf16.msra.mxu0 %v815_v58 }
 0x116   : > { %v805_v1 = vpack.c.bf16 %v893_v59, %v888_v62  ;;  %v318_v2 = vsel %vm317_vm8, %v887_v63, %v888_v62  ;;  %v901_v3 = vpop.permute.xlu0 %900  ;;  %790 = vmatprep.subr.msk.mxu0 %vm212_vm3, %v520_v41 }
 0x117   : > { %v807_v4 = vpack.c.bf16 %v319_v0, %v318_v2  ;;  %v903_v5 = vunpack.i.h.bf16 %v901_v3  ;;  %v902_v6 = vunpack.i.l.bf16 %v901_v3  ;;  %v896_v7 = vpop.permute.xlu1 %895 }
 0x118   : > { %v898_v10 = vunpack.i.h.bf16 %v896_v7  ;;  %v897_v11 = vunpack.i.l.bf16 %v896_v7  ;;  %806 = vmatprep.subr.bf16.mxu1 %v805_v1 }
 0x119   : > { %v625_v12 = vsel %vm623_vm9, %v902_v6, %v903_v5  ;;  %808 = vmatpush1.bf16.msra.mxu1 %v807_v4  ;;  %791 = vmatpush1.msk.msra.mxu0 %vm212_vm3, %v524_v9 }
 0x11a   : > { %v817_v13 = vpack.c.bf16 %v903_v5, %v898_v10  ;;  %v624_v14 = vsel %vm623_vm9, %v897_v11, %v898_v10  ;;  %v316_v15 = vpop.permute.xlu0 %315  ;;  %792 = vmatmul.mubr.msk.f32.vlgmr.msra.gmra.mrb[0].mxu0 %vm218_vm5, %v789_v8 }
 0x11b   : > { %v819_v16 = vpack.c.bf16 %v625_v12, %v624_v14  ;;  %v314_v17 = vpop.permute.xlu1 %313  ;;  %782 = vmatprep.subr.msk.mxu1 %vm212_vm3, %v316_v15  ;;  %702 = vmatprep.mubr.f32.mxu0 %v921_v27 }
 0x11c   : > { %v320_v19 = vsel %vm317_vm8, %v314_v17, %v316_v15  ;;  %818 = vmatprep.subr.bf16.mxu0 %v817_v13 }
 0x11d   : > { %783 = vmatpush1.msk.msra.mxu1 %vm212_vm3, %v320_v19  ;;  %820 = vmatpush1.bf16.msra.mxu0 %v819_v16 }
 0x11e   : > { %v622_v20 = vpop.permute.xlu0 %621  ;;  %784 = vmatmul.mubr.msk.f32.vlgmr.msra.gmra.mrb[0].mxu1 %vm218_vm5, %v781_v18 }
 0x11f   : > { %v620_v21 = vpop.permute.xlu1 %619  ;;  %794 = vmatprep.subr.msk.mxu0 %vm212_vm3, %v622_v20 }
 0x120   : > { %v626_v23 = vsel %vm623_vm9, %v620_v21, %v622_v20 }
 0x121   : > { %795 = vmatpush1.msk.msra.mxu0 %vm212_vm3, %v626_v23 }
 0x122   : > { %796 = vmatmul.mubr.msk.f32.vlgmr.msra.gmra.mrb[0].mxu0 %vm218_vm5, %v793_v22 }
 0x130   : > { %v176_v24 = vpop.permute.xlu1 %175 }
 0x1f1   : > { %v398_v25 = vpop.f32.mrb[0].mxu1 }
 0x1f2   : > { %v400_v26 = vpop.f32.mrb[1].mxu1  ;;  %v821_v27 = vadd.f32 %v398_v25, %v176_v24 }
 0x1f3   : > { %v823_v28 = vadd.f32 %v400_v26, %v176_v24 }
 0x1f5   : > { %v704_v29 = vpop.f32.mrb[0].mxu0 }
 0x1f6   : > { %v822_v30 = vadd.f32 %v821_v27, %v704_v29  ;;  %v706_v31 = vpop.f32.mrb[1].mxu0 }
 0x1f7   : > { %v824_v32 = vadd.f32 %v823_v28, %v706_v31 }
 0x1f8   : > { %711 = vst [vmem:[%s170_s16] sm:$0xff] %v822_v30 }
 0x1f9   : > { %713 = vst.msk [vmem:[%s170_s16 + $0x8] sm:$0xff] %vm712_vm10, %v824_v32 }
 0x1fa PF: > { %s13_s12 = sadd.s32 1, %s914_s12  }
 0x1fb   : > { %p10_p4 = scmp.ge.s32.totalorder %s13_s12, 4  }
 0x1fd   :  { %12 = sbr.rel (!%p10_p4) target bundleno = 1 (0x1), region = 66 }

</bundles_post_ra>
